<compile_context>
chip_gen: v6e
topology: v6e:2x2x1
jax: 0.10.0
libtpu: 0.0.40
codegen_flags: <defaults>
</compile_context>

<pallas_src>
import jax
import jax.numpy as jnp
from jax.experimental import pallas as pl
from jax.experimental.pallas import tpu as pltpu


# --------------------------------------------------------------------------------------
# Kernel
# --------------------------------------------------------------------------------------
def cbam_kernel(x_ref, w1t_ref, w2t_ref, msp_ref, o_ref):
    # x_ref: (Bn, C, HW) lane-dense block; msp_ref: (2, HW, HW) structured conv operator.
    x = x_ref[...].astype(jnp.float32)                                   # (Bn, C, HW)

    # ---------- channel attention: global max / avg pool over the lane axis ----------
    max_c = jnp.max(x, axis=-1)                                          # (Bn, C)
    avg_c = jnp.mean(x, axis=-1)                                         # (Bn, C)

    w1t = w1t_ref[...]                                                   # (C, C_hid)
    w2t = w2t_ref[...]                                                   # (C_hid, C)

    # Shared MLP, batched over Bn images; second (linear) layer fused across max/avg branches.
    h = (jnp.maximum(jnp.dot(max_c, w1t, preferred_element_type=jnp.float32), 0.0)
         + jnp.maximum(jnp.dot(avg_c, w1t, preferred_element_type=jnp.float32), 0.0))
    ch_w = jax.nn.sigmoid(jnp.dot(h, w2t, preferred_element_type=jnp.float32))  # (Bn, C)

    x1 = x * ch_w[:, :, None]                                            # (Bn, C, HW)

    # ---------- spatial attention: mean/max over channels + 7x7 "same" conv (as matmul) ----------
    avg_sp = jnp.mean(x1, axis=1)                                        # (Bn, HW)
    max_sp = jnp.max(x1, axis=1)                                         # (Bn, HW)

    # Stage x1 through VMEM so it is not live in vregs across the conv matmuls.
    o_ref[...] = x1.astype(o_ref.dtype)

    conv = (jnp.dot(avg_sp, msp_ref[0], preferred_element_type=jnp.float32)
            + jnp.dot(max_sp, msp_ref[1], preferred_element_type=jnp.float32))   # (Bn, HW)
    sp_w = jax.nn.sigmoid(conv)                                          # (Bn, HW)

    # Read-modify-write the staged x1 with the spatial weights (lane-dense, unmasked stores).
    o_ref[...] = (o_ref[...].astype(jnp.float32) * sp_w[:, None, :]).astype(o_ref.dtype)


# --------------------------------------------------------------------------------------
# Wrapper-side weight preprocessing + pallas_call plumbing
# --------------------------------------------------------------------------------------
def _spatial_conv_operator(wsp, H, W):
    """(2, K, K) conv taps -> (2, H*W, H*W) dense 'same'-conv operators.

    out_flat = in_flat @ M[c] reproduces a stride-1, zero-padded ("same") KxK
    cross-correlation exactly (boundary taps simply absent from the matrix).
    """
    K = wsp.shape[-1]
    P = K // 2
    r = jnp.arange(H)
    c = jnp.arange(W)
    oi = r[:, None, None, None]            # output row
    oj = c[None, :, None, None]            # output col
    ii = r[None, None, :, None]            # input row
    ij = c[None, None, None, :]            # input col
    di = ii - oi + P                       # tap row index
    dj = ij - oj + P                       # tap col index
    valid = (di >= 0) & (di < K) & (dj >= 0) & (dj < K)
    taps = wsp[:, jnp.clip(di, 0, K - 1), jnp.clip(dj, 0, K - 1)]        # (2, H, W, H, W)
    taps = jnp.where(valid[None], taps, 0.0).astype(jnp.float32)
    m = taps.reshape(2, H * W, H * W)                                    # [c, out, in]
    return jnp.transpose(m, (0, 2, 1))                                   # [c, in, out]


def _pick_bn(N, bytes_per_image, max_block_bytes=2 << 20):
    """Images per grid step: amortize per-step overhead while keeping double-buffered
    in/out blocks (~4x block bytes) well inside scoped VMEM on every generation
    (v5e: 16 MiB default scoped, v7x: 32 MiB scoped / 64 MiB physical)."""
    bn = max(1, min(N, max_block_bytes // max(1, bytes_per_image)))
    while N % bn:
        bn -= 1
    return bn


def cbam_attention(x, w1, w2, wsp, *, kernel_size=7):
    N, C, H, W = x.shape
    HW = H * W
    C_hid = w1.shape[0]
    assert wsp.shape == (2, kernel_size, kernel_size)

    x_flat = x.reshape(N, C, HW)                                   # lane-dense spatial layout
    w1t = jnp.transpose(w1).astype(jnp.float32)                    # (C, C_hid)
    w2t = jnp.transpose(w2).astype(jnp.float32)                    # (C_hid, C)
    msp = _spatial_conv_operator(wsp.astype(jnp.float32), H, W)    # (2, HW, HW)

    bn = _pick_bn(N, C * HW * x.dtype.itemsize)
    grid = (N // bn,)

    out_flat = pl.pallas_call(
        cbam_kernel,
        out_shape=jax.ShapeDtypeStruct((N, C, HW), x.dtype),
        grid=grid,
        in_specs=[
            pl.BlockSpec((bn, C, HW), lambda n: (n, 0, 0)),
            pl.BlockSpec((C, C_hid), lambda n: (0, 0)),
            pl.BlockSpec((C_hid, C), lambda n: (0, 0)),
            pl.BlockSpec((2, HW, HW), lambda n: (0, 0, 0)),
        ],
        out_specs=pl.BlockSpec((bn, C, HW), lambda n: (n, 0, 0)),
        compiler_params=pltpu.CompilerParams(
            dimension_semantics=("parallel",),          # batch axis -> both v7x TensorCores
            vmem_limit_bytes=32 * 1024 * 1024,
        ),
    )(x_flat, w1t, w2t, msp)

    return out_flat.reshape(N, C, H, W)


# --------------------------------------------------------------------------------------
# Pure-JAX reference (intended CBAM semantics) + self-check
# --------------------------------------------------------------------------------------
def cbam_ref(x, w1, w2, wsp):
    avg = jnp.mean(x, axis=(2, 3))                                       # (N, C)
    mx = jnp.max(x, axis=(2, 3))                                         # (N, C)

    def mlp(v):
        h = jnp.maximum(jnp.einsum("hc,nc->nh", w1, v), 0.0)
        return jnp.einsum("ch,nh->nc", w2, h)

    ch = jax.nn.sigmoid(mlp(mx) + mlp(avg))[:, :, None, None]            # (N, C, 1, 1)
    x1 = x * ch
    sp_in = jnp.concatenate(
        [jnp.mean(x1, axis=1, keepdims=True), jnp.max(x1, axis=1, keepdims=True)], axis=1
    )                                                                    # (N, 2, H, W)
    P = wsp.shape[-1] // 2
    conv = jax.lax.conv_general_dilated(
        sp_in, wsp[None],                                                # (1, 2, K, K)
        window_strides=(1, 1), padding=((P, P), (P, P)),
        dimension_numbers=("NCHW", "OIHW", "NCHW"),
    )
    return x1 * jax.nn.sigmoid(conv)


if __name__ == "__main__":
    N, C, H, W = 2, 32, 16, 16
    reduction = 8
    C_hid = C // reduction
    K = 7

    key = jax.random.PRNGKey(0)
    kx, k1, k2, k3 = jax.random.split(key, 4)
    x = jax.random.normal(kx, (N, C, H, W), jnp.float32)
    # deterministic synthetic weights (Conv2d 1x1 weights squeezed to 2-D, 7x7 conv weights)
    w1 = jax.random.normal(k1, (C_hid, C), jnp.float32) * (1.0 / jnp.sqrt(C))
    w2 = jax.random.normal(k2, (C, C_hid), jnp.float32) * (1.0 / jnp.sqrt(C_hid))
    wsp = jax.random.normal(k3, (2, K, K), jnp.float32) * (1.0 / jnp.sqrt(2.0 * K * K))

    out = cbam_attention(x, w1, w2, wsp, kernel_size=K)
    out = jax.block_until_ready(out)

    ref = cbam_ref(x, w1, w2, wsp)
    assert out.shape == (N, C, H, W)
    assert jnp.allclose(out, ref, atol=1e-4, rtol=1e-4), float(jnp.max(jnp.abs(out - ref)))
    print("KERNEL_OK")
</pallas_src>

<mosaic_0001>
module attributes {stable_mosaic.version = 11 : i64} {
  func.func @cbam_kernel(%arg0: i32, %arg1: memref<2x32x256xf32, #tpu.memory_space<vmem>>, %arg2: memref<32x4xf32, #tpu.memory_space<vmem>>, %arg3: memref<4x32xf32, #tpu.memory_space<vmem>>, %arg4: memref<2x256x256xf32, #tpu.memory_space<vmem>>, %arg5: memref<2x32x256xf32, #tpu.memory_space<vmem>>) attributes {dimension_semantics = [#tpu.dimension_semantics<parallel>], iteration_bounds = array<i64: 1>, scalar_prefetch = 0 : i64, scratch_operands = 0 : i64, tpu.core_type = #tpu.core_type<tc>, window_params = [{transform_indices = @transform_0, window_bounds = array<i64: 2, 32, 256>}, {pipeline_mode = #tpu.pipeline_mode<synchronous>, transform_indices = @transform_1, window_bounds = array<i64: 32, 4>}, {pipeline_mode = #tpu.pipeline_mode<synchronous>, transform_indices = @transform_2, window_bounds = array<i64: 4, 32>}, {pipeline_mode = #tpu.pipeline_mode<synchronous>, transform_indices = @transform_3, window_bounds = array<i64: 2, 256, 256>}, {transform_indices = @transform_4, window_bounds = array<i64: 2, 32, 256>}]} {
    %c0 = arith.constant 0 : index
    %c0_0 = arith.constant 0 : index
    %c0_1 = arith.constant 0 : index
    %0 = vector.load %arg1[%c0, %c0_0, %c0_1] : memref<2x32x256xf32, #tpu.memory_space<vmem>>, vector<2x32x256xf32>
    %cst = arith.constant dense<0xFF800000> : vector<2x32xf32>
    %1 = vector.multi_reduction <maximumf>, %0, %cst [2] : vector<2x32x256xf32> to vector<2x32xf32>
    %cst_2 = arith.constant dense<0.000000e+00> : vector<2x32xf32>
    %2 = vector.multi_reduction <add>, %0, %cst_2 [2] : vector<2x32x256xf32> to vector<2x32xf32>
    %cst_3 = arith.constant 2.560000e+02 : f32
    %3 = vector.broadcast %cst_3 : f32 to vector<2x32xf32>
    %4 = arith.divf %2, %3 : vector<2x32xf32>
    %c0_4 = arith.constant 0 : index
    %c0_5 = arith.constant 0 : index
    %5 = vector.load %arg2[%c0_4, %c0_5] : memref<32x4xf32, #tpu.memory_space<vmem>>, vector<32x4xf32>
    %c0_6 = arith.constant 0 : index
    %c0_7 = arith.constant 0 : index
    %6 = vector.load %arg3[%c0_6, %c0_7] : memref<4x32xf32, #tpu.memory_space<vmem>>, vector<4x32xf32>
    %cst_8 = arith.constant dense<0.000000e+00> : vector<2x4xf32>
    %7 = tpu.matmul %1, %5, %cst_8 {dimension_numbers = #tpu.dot_dimension_numbers<[1], [0], [0], [1], [0, 0, 1, 1], [], []>} : vector<2x32xf32>, vector<32x4xf32>, vector<2x4xf32> -> vector<2x4xf32>
    %cst_9 = arith.constant 0.000000e+00 : f32
    %8 = vector.broadcast %cst_9 : f32 to vector<2x4xf32>
    %9 = arith.maximumf %7, %8 : vector<2x4xf32>
    %cst_10 = arith.constant dense<0.000000e+00> : vector<2x4xf32>
    %10 = tpu.matmul %4, %5, %cst_10 {dimension_numbers = #tpu.dot_dimension_numbers<[1], [0], [0], [1], [0, 0, 1, 1], [], []>} : vector<2x32xf32>, vector<32x4xf32>, vector<2x4xf32> -> vector<2x4xf32>
    %cst_11 = arith.constant 0.000000e+00 : f32
    %11 = vector.broadcast %cst_11 : f32 to vector<2x4xf32>
    %12 = arith.maximumf %10, %11 : vector<2x4xf32>
    %13 = arith.addf %9, %12 : vector<2x4xf32>
    %cst_12 = arith.constant dense<0.000000e+00> : vector<2x32xf32>
    %14 = tpu.matmul %13, %6, %cst_12 {dimension_numbers = #tpu.dot_dimension_numbers<[1], [0], [0], [1], [0, 0, 1, 1], [], []>} : vector<2x4xf32>, vector<4x32xf32>, vector<2x32xf32> -> vector<2x32xf32>
    %15 = arith.negf %14 : vector<2x32xf32>
    %16 = math.exp %15 : vector<2x32xf32>
    %cst_13 = arith.constant 1.000000e+00 : f32
    %17 = vector.broadcast %cst_13 : f32 to vector<2x32xf32>
    %18 = arith.addf %17, %16 : vector<2x32xf32>
    %19 = arith.divf %17, %18 : vector<2x32xf32>
    %20 = vector.shape_cast %19 : vector<2x32xf32> to vector<2x32x1xf32>
    %21 = vector.broadcast %20 : vector<2x32x1xf32> to vector<2x32x256xf32>
    %22 = arith.mulf %0, %21 : vector<2x32x256xf32>
    %cst_14 = arith.constant dense<0.000000e+00> : vector<2x256xf32>
    %23 = vector.multi_reduction <add>, %22, %cst_14 [1] : vector<2x32x256xf32> to vector<2x256xf32>
    %cst_15 = arith.constant 3.200000e+01 : f32
    %24 = vector.broadcast %cst_15 : f32 to vector<2x256xf32>
    %25 = arith.divf %23, %24 : vector<2x256xf32>
    %cst_16 = arith.constant dense<0xFF800000> : vector<2x256xf32>
    %26 = vector.multi_reduction <maximumf>, %22, %cst_16 [1] : vector<2x32x256xf32> to vector<2x256xf32>
    %c0_17 = arith.constant 0 : index
    %c0_18 = arith.constant 0 : index
    %c0_19 = arith.constant 0 : index
    %27 = vector.load %arg5[%c0_17, %c0_18, %c0_19] : memref<2x32x256xf32, #tpu.memory_space<vmem>>, vector<2x32x256xf32>
    tpu.vector_store %arg5[%c0_17, %c0_18, %c0_19], %22 {strides = array<i32>} : memref<2x32x256xf32, #tpu.memory_space<vmem>>, vector<2x32x256xf32>,
    %c0_20 = arith.constant 0 : index
    %c0_21 = arith.constant 0 : index
    %c0_22 = arith.constant 0 : index
    %28 = vector.load %arg4[%c0_20, %c0_21, %c0_22] : memref<2x256x256xf32, #tpu.memory_space<vmem>>, vector<1x256x256xf32>
    %29 = vector.shape_cast %28 : vector<1x256x256xf32> to vector<256x256xf32>
    %cst_23 = arith.constant dense<0.000000e+00> : vector<2x256xf32>
    %30 = tpu.matmul %25, %29, %cst_23 {dimension_numbers = #tpu.dot_dimension_numbers<[1], [0], [0], [1], [0, 0, 1, 1], [], []>} : vector<2x256xf32>, vector<256x256xf32>, vector<2x256xf32> -> vector<2x256xf32>
    %c1 = arith.constant 1 : index
    %c0_24 = arith.constant 0 : index
    %c0_25 = arith.constant 0 : index
    %31 = vector.load %arg4[%c1, %c0_24, %c0_25] : memref<2x256x256xf32, #tpu.memory_space<vmem>>, vector<1x256x256xf32>
    %32 = vector.shape_cast %31 : vector<1x256x256xf32> to vector<256x256xf32>
    %cst_26 = arith.constant dense<0.000000e+00> : vector<2x256xf32>
    %33 = tpu.matmul %26, %32, %cst_26 {dimension_numbers = #tpu.dot_dimension_numbers<[1], [0], [0], [1], [0, 0, 1, 1], [], []>} : vector<2x256xf32>, vector<256x256xf32>, vector<2x256xf32> -> vector<2x256xf32>
    %34 = arith.addf %30, %33 : vector<2x256xf32>
    %35 = arith.negf %34 : vector<2x256xf32>
    %36 = math.exp %35 : vector<2x256xf32>
    %cst_27 = arith.constant 1.000000e+00 : f32
    %37 = vector.broadcast %cst_27 : f32 to vector<2x256xf32>
    %38 = arith.addf %37, %36 : vector<2x256xf32>
    %39 = arith.divf %37, %38 : vector<2x256xf32>
    %c0_28 = arith.constant 0 : index
    %c0_29 = arith.constant 0 : index
    %c0_30 = arith.constant 0 : index
    %40 = vector.load %arg5[%c0_28, %c0_29, %c0_30] : memref<2x32x256xf32, #tpu.memory_space<vmem>>, vector<2x32x256xf32>
    %41 = vector.shape_cast %39 : vector<2x256xf32> to vector<2x1x256xf32>
    %42 = vector.broadcast %41 : vector<2x1x256xf32> to vector<2x32x256xf32>
    %43 = arith.mulf %40, %42 : vector<2x32x256xf32>
    %c0_31 = arith.constant 0 : index
    %c0_32 = arith.constant 0 : index
    %c0_33 = arith.constant 0 : index
    %44 = vector.load %arg5[%c0_31, %c0_32, %c0_33] : memref<2x32x256xf32, #tpu.memory_space<vmem>>, vector<2x32x256xf32>
    tpu.vector_store %arg5[%c0_31, %c0_32, %c0_33], %43 {strides = array<i32>} : memref<2x32x256xf32, #tpu.memory_space<vmem>>, vector<2x32x256xf32>,
    return
  }
  func.func @transform_0(%arg0: i32) -> (i32, i32, i32) {
    %c0_i32 = arith.constant 0 : i32
    %c0_i32_0 = arith.constant 0 : i32
    %c0_i32_1 = arith.constant 0 : i32
    return %arg0, %c0_i32, %c0_i32_0 : i32, i32, i32
  }
  func.func @transform_1(%arg0: i32) -> (i32, i32) {
    %c0_i32 = arith.constant 0 : i32
    %c0_i32_0 = arith.constant 0 : i32
    %c0_i32_1 = arith.constant 0 : i32
    return %c0_i32, %c0_i32_0 : i32, i32
  }
  func.func @transform_2(%arg0: i32) -> (i32, i32) {
    %c0_i32 = arith.constant 0 : i32
    %c0_i32_0 = arith.constant 0 : i32
    %c0_i32_1 = arith.constant 0 : i32
    return %c0_i32, %c0_i32_0 : i32, i32
  }
  func.func @transform_3(%arg0: i32) -> (i32, i32, i32) {
    %c0_i32 = arith.constant 0 : i32
    %c0_i32_0 = arith.constant 0 : i32
    %c0_i32_1 = arith.constant 0 : i32
    %c0_i32_2 = arith.constant 0 : i32
    return %c0_i32, %c0_i32_0, %c0_i32_1 : i32, i32, i32
  }
  func.func @transform_4(%arg0: i32) -> (i32, i32, i32) {
    %c0_i32 = arith.constant 0 : i32
    %c0_i32_0 = arith.constant 0 : i32
    %c0_i32_1 = arith.constant 0 : i32
    return %arg0, %c0_i32, %c0_i32_0 : i32, i32, i32
  }
}

</mosaic_0001>

<bundles_post_ra>
// kernel: tpu_custom_call.1
= control target key start
LH: loop header
LB: loop body
LE: loop exit
PB: predicated region body
PF: predicated region fallthrough
CT: control target
= control target key end

     0   :  { %9 = vsyncpa [#allocation3], 0  ;;  %s1428_s0 = inlined_call_operand.hbm [shape: f32[2,32,256], index: 0, kind: input, shape index: {}]   ;;  %s1429_s1 = inlined_call_operand.vmem [shape: f32[32,4], index: 1, kind: input, shape index: {}]   ;;  %s1430_s2 = inlined_call_operand.vmem [shape: f32[4,32], index: 2, kind: input, shape index: {}]   ;;  %s1431_s3 = inlined_call_operand.hbm [shape: f32[2,256,256], index: 3, kind: input, shape index: {}]   ;;  %s1432_s4 = inlined_call_operand.hbm [shape: f32[2,32,256], index: 4, kind: output, shape index: {}]  }
   0x1   :  { %10 = vsyncpa [#allocation6], 0 }
   0x2   :  { %11 = vsyncpa [#allocation4], 0  ;;  %s1148_s15 = smov [#allocation2]  }
   0x3   :  { %s17_s16 = sshll.u32 %s1148_s15, 4  ;;  %s18_s16 = int_to_ptr.vmem [resolvable:$true] %s17_s16 }
   0x4   :  { %s1090_s17 = scalar_lea.vmem %s18_s16, 2048  ;;  %p1095_p1 = scmp.lt.s32.totalorder %s18_s16, %s18_s16 }
   0x5   :  { %p1091_p0 = scmp.ne.s32.totalorder %s18_s16, %s1090_s17  ;;  %p1096_p2 = scmp.lt.s32.totalorder %s1090_s17, %s1090_s17 }
   0x7   :  { %p1097_p3 = por %p1096_p2, %p1095_p1 }
   0x9   :  { %p1098_p4 = pnand %p1097_p3, %p1091_p0 }
   0xb   :  { %1101 = shalt.err (!%p1098_p4)
}
   0xc   :  { %s1149_s18 = smov 256   ;;  %s1150_s19 = smov 16  }
   0xd   :  { %23 = dma.hbm_to_vmem [thread:$0]  %s1428_s0, 2048, %s18_s16, [#allocation3], %s1149_s18, %s1149_s18, %s1150_s19  }
   0xe   :  { %s1151_s22 = smov [#allocation5]  }
   0xf   :  { %s33_s23 = sshll.u32 %s1151_s22, 4  ;;  %s34_s23 = int_to_ptr.vmem [resolvable:$true] %s33_s23 }
  0x10   :  { %s1110_s24 = scalar_lea.vmem %s34_s23, 16384  ;;  %p1115_p6 = scmp.lt.s32.totalorder %s34_s23, %s34_s23 }
  0x11   :  { %p1111_p5 = scmp.ne.s32.totalorder %s34_s23, %s1110_s24  ;;  %p1116_p7 = scmp.lt.s32.totalorder %s1110_s24, %s1110_s24 }
  0x13   :  { %p1117_p8 = por %p1116_p7, %p1115_p6 }
  0x15   :  { %p1118_p9 = pnand %p1117_p8, %p1111_p5 }
  0x17   :  { %1121 = shalt.err (!%p1118_p9)
}
  0x18   :  { %39 = dma.hbm_to_vmem [thread:$0]  %s1431_s3, 16384, %s34_s23, [#allocation6], %s1149_s18, %s1149_s18, %s1150_s19  }
  0x19   :  { %1142 = dma.done.wait [#allocation3], 2048  }
  0x1a   :  { %1143 = vsyncadd [#allocation3], 4294965248 }
  0x1b   :  { %1144 = dma.done.wait [#allocation6], 16384  }
  0x1c   :  { %1145 = vsyncadd [#allocation6], 4294950912  ;;  %v1193_v0 = vld [vmem:[#allocation2 + $0x40] sm:$0xff]  ;;  %v1195_v1 = vld [vmem:[#allocation2 + $0x48] sm:$0xff]  ;;  %v1152_v32 = vmov 0.0   ;;  %vm1153_vm0 = vmmov 0   ;;  %v132_v40 = vlaneseq }
  0x1d   :  { %v1197_v2 = vld [vmem:[#allocation2] sm:$0xff]  ;;  %v98_v3 = vadd.f32 %v1195_v1, %v1193_v0  ;;  %v1201_v4 = vld [vmem:[#allocation2 + $0x8] sm:$0xff]  ;;  %v1203_v5 = vld [vmem:[#allocation2 + $0x50] sm:$0xff]  ;;  %v74_v21 = vmax.f32 %v1193_v0, %v1195_v1  ;;  %1046 = vmatprep.subr.mxu1 %v1152_v32  ;;  %1035 = vmatprep.subr.mxu0 %v1152_v32  ;;  %vm143_vm1 = vcmask 130112   ;;  %vm150_vm2 = vcmask 195712  }
  0x1e   :  { %v1205_v6 = vld [vmem:[#allocation2 + $0x58] sm:$0xff]  ;;  %v86_v7 = vadd.f32 %v1201_v4, %v1197_v2  ;;  %v1209_v8 = vld [vmem:[#allocation2 + $0x10] sm:$0xff]  ;;  %v1217_v12 = vld [vmem:[#allocation2 + $0x60] sm:$0xff]  ;;  %v62_v19 = vmax.f32 %v1197_v2, %v1201_v4  ;;  %1054 = vmatprep.mubr.msk.f32.mxu1 %vm1153_vm0, %v1152_v32  ;;  %1043 = vmatprep.mubr.msk.f32.mxu0 %vm1153_vm0, %v1152_v32  ;;  %v133_v43 = vand.u32 127, %v132_v40  ;;  %v1282_v48 = vshrl.u32 %v132_v40, 7 }
  0x1f   :  { %v1211_v9 = vld [vmem:[#allocation2 + $0x18] sm:$0xff]  ;;  %99 = vadd.xlane.f32.xlu1 %v98_v3  ;;  %v101_v10 = vadd.f32 %v1205_v6, %v1203_v5  ;;  %v1219_v13 = vld [vmem:[#allocation2 + $0x68] sm:$0xff]  ;;  %v1221_v14 = vld [vmem:[#allocation2 + $0x20] sm:$0xff]  ;;  %v77_v20 = vmax.f32 %v1203_v5, %v1205_v6  ;;  %vm157_vm3 = vcmask 261312   ;;  %vm178_vm4 = vcmask 1041409  }
  0x20   :  { %87 = vadd.xlane.f32.xlu0 %v86_v7  ;;  %v89_v11 = vadd.f32 %v1211_v9, %v1209_v8  ;;  %v1223_v15 = vld [vmem:[#allocation2 + $0x28] sm:$0xff]  ;;  %v104_v16 = vadd.f32 %v1219_v13, %v1217_v12  ;;  %v65_v18 = vmax.f32 %v1209_v8, %v1211_v9  ;;  %v1237_v22 = vld [vmem:[#allocation2 + $0x70] sm:$0xff]  ;;  %v1239_v23 = vld [vmem:[#allocation2 + $0x78] sm:$0xff]  ;;  %v80_v28 = vmax.f32 %v1217_v12, %v1219_v13 }
  0x21   :  { %v92_v17 = vadd.f32 %v1223_v15, %v1221_v14  ;;  %v1241_v24 = vld [vmem:[#allocation2 + $0x30] sm:$0xff]  ;;  %v1243_v25 = vld [vmem:[#allocation2 + $0x38] sm:$0xff]  ;;  %v107_v26 = vadd.f32 %v1239_v23, %v1237_v22  ;;  %v68_v29 = vmax.f32 %v1221_v14, %v1223_v15  ;;  %v83_v30 = vmax.f32 %v1237_v22, %v1239_v23  ;;  %v120_v35 = vld [vmem:[%s1429_s1 + $0x8] sm:$0xff] }
  0x22   :  { %v95_v27 = vadd.f32 %v1243_v25, %v1241_v24  ;;  %v71_v31 = vmax.f32 %v1241_v24, %v1243_v25  ;;  %v122_v33 = vld [vmem:[%s1429_s1 + $0x18] sm:$0xff]  ;;  %v121_v34 = vld [vmem:[%s1429_s1 + $0x10] sm:$0xff]  ;;  %v119_v36 = vld [vmem:[%s1429_s1] sm:$0xff]  ;;  %v138_v45 = vadd.s32 4294967288, %v133_v43  ;;  %v145_v46 = vadd.s32 4294967280, %v133_v43 }
  0x23   :  { %102 = vadd.xlane.f32.xlu1 %v101_v10  ;;  %1047 = vmatpush3.msra.mxu1 %v122_v33  ;;  %v152_v52 = vadd.s32 4294967272, %v133_v43  ;;  %v136_v57 = vsub.s32 %v133_v43, %v1282_v48  ;;  %vm180_vm5 = vcmask 261120   ;;  %vm379_vm6 = vcmask 1043456  }
  0x24   :  { %90 = vadd.xlane.f32.xlu0 %v89_v11  ;;  %1048 = vmatprep.subr.mxu1 %v1152_v32  ;;  %v141_v50 = vsub.s32 %v138_v45, %v1282_v48  ;;  %v148_v54 = vsub.s32 %v145_v46, %v1282_v48  ;;  %vm375_vm7 = vcmask 31744  }
  0x25   :  { %1036 = vmatpush3.msra.mxu0 %v122_v33  ;;  %1049 = vmatpush3.msra.mxu1 %v121_v34  ;;  %v155_v63 = vsub.s32 %v152_v52, %v1282_v48 }
  0x26   :  { %1037 = vmatprep.subr.mxu0 %v1152_v32  ;;  %1050 = vmatprep.subr.mxu1 %v1152_v32 }
  0x27   :  { %105 = vadd.xlane.f32.xlu1 %v104_v16  ;;  %1038 = vmatpush3.msra.mxu0 %v121_v34 }
  0x28   :  { %93 = vadd.xlane.f32.xlu0 %v92_v17  ;;  %1051 = vmatpush3.msra.mxu1 %v120_v35 }
  0x29   :  { %1039 = vmatprep.subr.mxu0 %v1152_v32  ;;  %1052 = vmatprep.subr.mxu1 %v1152_v32 }
  0x2a   :  { %1040 = vmatpush3.msra.mxu0 %v120_v35  ;;  %1053 = vmatpush3.msra.mxu1 %v119_v36 }
  0x2b   :  { %66 = vmax.xlane.f32.xlu1 %v65_v18  ;;  %1041 = vmatprep.subr.mxu0 %v1152_v32 }
  0x2c   :  { %63 = vmax.xlane.f32.xlu0 %v62_v19  ;;  %1042 = vmatpush3.msra.mxu0 %v119_v36 }
  0x2d   :  { %1057 = vmatprep.subr.mxu0 %v1152_v32 }
  0x2f   :  { %78 = vmax.xlane.f32.xlu1 %v77_v20 }
  0x30   :  { %75 = vmax.xlane.f32.xlu0 %v74_v21 }
  0x33   :  { %108 = vadd.xlane.f32.xlu1 %v107_v26 }
  0x34   :  { %96 = vadd.xlane.f32.xlu0 %v95_v27 }
  0x37   :  { %81 = vmax.xlane.f32.xlu1 %v80_v28 }
  0x38   :  { %69 = vmax.xlane.f32.xlu0 %v68_v29 }
  0x3b   :  { %84 = vmax.xlane.f32.xlu1 %v83_v30 }
  0x3c   :  { %72 = vmax.xlane.f32.xlu0 %v71_v31 }
  0xa8   :  { %v100_v37 = vpop.xlane.xlu1 %99 }
  0xa9   :  { %v88_v38 = vpop.xlane.xlu0 %87  ;;  %v115_v58 = vmul.f32 0.00390625, %v100_v37 }
  0xaa   :  { %v111_v61 = vmul.f32 0.00390625, %v88_v38 }
  0xab   :  { %v284_v11 = vrot.slane %v115_v58, %v136_v57 }
  0xac   :  { %v103_v39 = vpop.xlane.xlu1 %102  ;;  %v265_v19 = vrot.slane %v111_v61, %v136_v57 }
  0xad   :  { %v91_v41 = vpop.xlane.xlu0 %90  ;;  %v116_v51 = vmul.f32 0.00390625, %v103_v39 }
  0xae   :  { %v112_v53 = vmul.f32 0.00390625, %v91_v41 }
  0xaf   :  { %v288_v62 = vrot.slane %v116_v51, %v141_v50 }
  0xb0   :  { %v106_v42 = vpop.xlane.xlu1 %105  ;;  %v269_v3 = vrot.slane %v112_v53, %v141_v50 }
  0xb1   :  { %v94_v44 = vpop.xlane.xlu0 %93  ;;  %v117_v55 = vmul.f32 0.00390625, %v106_v42  ;;  %v289_v21 = vsel %vm143_vm1, %v288_v62, %v284_v11  ;;  %v636_v11 = vld [vmem:[#allocation5 + $0xf0] sm:$0xff] }
  0xb2   :  { %v113_v59 = vmul.f32 0.00390625, %v94_v44  ;;  %v270_v27 = vsel %vm143_vm1, %v269_v3, %v265_v19  ;;  %v701_v3 = vld [vmem:[#allocation5 + $0x2f0] sm:$0xff]  ;;  %v634_v19 = vld [vmem:[#allocation5 + $0xe0] sm:$0xff] }
  0xb3   :  { %v293_v7 = vrot.slane %v117_v55, %v148_v54  ;;  %v123_v55 = vld [vmem:[%s1430_s2] sm:$0xf]  ;;  %s1155_s2 = smov [#allocation7]  }
  0xb4   :  { %v67_v47 = vpop.xlane.xlu1 %66  ;;  %v274_v16 = vrot.slane %v113_v59, %v148_v54  ;;  %s1003_s8 = sshll.u32 %s1155_s2, 4  ;;  %s1004_s8 = int_to_ptr.vmem [resolvable:$true] %s1003_s8 }
  0xb5   :  { %v64_v49 = vpop.xlane.xlu0 %63  ;;  %v294_v28 = vsel %vm150_vm2, %v293_v7, %v289_v21  ;;  %v142_v37 = vrot.slane %v67_v47, %v141_v50  ;;  %v700_v7 = vld [vmem:[#allocation5 + $0x2e8] sm:$0xff]  ;;  %s1122_s9 = scalar_lea.vmem %s1004_s8, 2048  ;;  %p1127_p11 = scmp.lt.s32.totalorder %s1004_s8, %s1004_s8 }
  0xb6   :  { %v275_v31 = vsel %vm150_vm2, %v274_v16, %v270_v27  ;;  %v137_v38 = vrot.slane %v64_v49, %v136_v57  ;;  %v698_v16 = vld [vmem:[#allocation5 + $0x2d8] sm:$0xff]  ;;  %v696_v21 = vld [vmem:[#allocation5 + $0x2c8] sm:$0xff]  ;;  %v695_v27 = vld [vmem:[#allocation5 + $0x2c0] sm:$0xff]  ;;  %p1123_p10 = scmp.ne.s32.totalorder %s1004_s8, %s1122_s9  ;;  %p1128_p12 = scmp.lt.s32.totalorder %s1122_s9, %s1122_s9 }
  0xb8   :  { %v79_v56 = vpop.xlane.xlu1 %78  ;;  %v144_v51 = vsel %vm143_vm1, %v142_v37, %v137_v38  ;;  %v627_v37 = vld [vmem:[#allocation5 + $0xa8] sm:$0xff]  ;;  %v690_v38 = vld [vmem:[#allocation5 + $0x298] sm:$0xff]  ;;  %p1129_p13 = por %p1128_p12, %p1127_p11 }
  0xb9   :  { %v76_v60 = vpop.xlane.xlu0 %75  ;;  %v166_v33 = vrot.slane %v79_v56, %v141_v50 }
  0xba   :  { %v162_v34 = vrot.slane %v76_v60, %v136_v57  ;;  %p1130_p0 = pnand %p1129_p13, %p1123_p10 }
  0xbc   :  { %v109_v10 = vpop.xlane.xlu1 %108  ;;  %v167_v44 = vsel %vm143_vm1, %v166_v33, %v162_v34  ;;  %v629_v33 = vld [vmem:[#allocation5 + $0xb8] sm:$0xff]  ;;  %v692_v34 = vld [vmem:[#allocation5 + $0x2a8] sm:$0xff] }
  0xbd   :  { %v118_v17 = vmul.f32 0.00390625, %v109_v10  ;;  %v97_v18 = vpop.xlane.xlu0 %96  ;;  %v699_v10 = vld [vmem:[#allocation5 + $0x2e0] sm:$0xff] }
  0xbe   :  { %v114_v20 = vmul.f32 0.00390625, %v97_v18  ;;  %v697_v18 = vld [vmem:[#allocation5 + $0x2d0] sm:$0xff] }
  0xbf   :  { %v298_v26 = vrot.slane %v118_v17, %v155_v63  ;;  %v635_v17 = vld [vmem:[#allocation5 + $0xe8] sm:$0xff] }
  0xc0   :  { %v279_v29 = vrot.slane %v114_v20, %v155_v63  ;;  %v82_v30 = vpop.xlane.xlu1 %81  ;;  %v633_v20 = vld [vmem:[#allocation5 + $0xd8] sm:$0xff] }
  0xc1   :  { %v70_v35 = vpop.xlane.xlu0 %69  ;;  %v299_v36 = vsel %vm157_vm3, %v298_v26, %v294_v28  ;;  %v171_v39 = vrot.slane %v82_v30, %v148_v54  ;;  %v632_v26 = vld [vmem:[#allocation5 + $0xd0] sm:$0xff]  ;;  %v631_v28 = vld [vmem:[#allocation5 + $0xc8] sm:$0xff]  ;;  %v630_v30 = vld [vmem:[#allocation5 + $0xc0] sm:$0xff] }
  0xc2   :  { %v280_v40 = vsel %vm157_vm3, %v279_v29, %v275_v31  ;;  %v149_v41 = vrot.slane %v70_v35, %v148_v54  ;;  %v694_v29 = vld [vmem:[#allocation5 + $0x2b8] sm:$0xff]  ;;  %v693_v31 = vld [vmem:[#allocation5 + $0x2b0] sm:$0xff] }
  0xc3   :  { %v300_v42 = vsel %vm178_vm4, %v299_v36, %v280_v40  ;;  %v172_v52 = vsel %vm150_vm2, %v171_v39, %v167_v44  ;;  %v628_v35 = vld [vmem:[#allocation5 + $0xb0] sm:$0xff]  ;;  %v691_v36 = vld [vmem:[#allocation5 + $0x2a0] sm:$0xff] }
  0xc4   :  { %1055 = vmatmul.mubr.msk.f32.vlgmr.msra.gmra.mxu1 %vm180_vm5, %v300_v42  ;;  %v85_v43 = vpop.xlane.xlu1 %84  ;;  %v151_v47 = vsel %vm150_vm2, %v149_v41, %v144_v51  ;;  %v626_v39 = vld [vmem:[#allocation5 + $0xa0] sm:$0xff]  ;;  %v689_v40 = vld [vmem:[#allocation5 + $0x290] sm:$0xff]  ;;  %v625_v41 = vld [vmem:[#allocation5 + $0x98] sm:$0xff] }
  0xc5   :  { %v176_v45 = vrot.slane %v85_v43, %v155_v63  ;;  %v73_v46 = vpop.xlane.xlu0 %72  ;;  %v688_v42 = vld [vmem:[#allocation5 + $0x288] sm:$0xff]  ;;  %v624_v43 = vld [vmem:[#allocation5 + $0x90] sm:$0xff]  ;;  %v687_v44 = vld [vmem:[#allocation5 + $0x280] sm:$0xff] }
  0xc6   :  { %v156_v53 = vrot.slane %v73_v46, %v155_v63  ;;  %v702_v63 = vld [vmem:[#allocation5 + $0x2f8] sm:$0xff]  ;;  %v622_v51 = vld [vmem:[#allocation5 + $0x80] sm:$0xff] }
  0xc7   :  { %v177_v49 = vsel %vm157_vm3, %v176_v45, %v172_v52  ;;  %743 = vmatprep.subr.mxu1 %v702_v63  ;;  %v623_v45 = vld [vmem:[#allocation5 + $0x88] sm:$0xff]  ;;  %v686_v46 = vld [vmem:[#allocation5 + $0x278] sm:$0xff]  ;;  %v685_v52 = vld [vmem:[#allocation5 + $0x270] sm:$0xff] }
  0xc8   :  { %v158_v50 = vsel %vm157_vm3, %v156_v53, %v151_v47  ;;  %744 = vmatpush1.msra.mxu1 %v701_v3  ;;  %v621_v53 = vld [vmem:[#allocation5 + $0x78] sm:$0xff]  ;;  %v684_v47 = vld [vmem:[#allocation5 + $0x268] sm:$0xff]  ;;  %v614_v3 = vld [vmem:[#allocation5 + $0x40] sm:$0xff] }
  0xc9   :  { %v179_v54 = vsel %vm178_vm4, %v177_v49, %v158_v50  ;;  %745 = vmatprep.subr.mxu1 %v700_v7  ;;  %v620_v49 = vld [vmem:[#allocation5 + $0x70] sm:$0xff]  ;;  %v683_v50 = vld [vmem:[#allocation5 + $0x260] sm:$0xff]  ;;  %v678_v63 = vld [vmem:[#allocation5 + $0x238] sm:$0xff] }
  0xca   :  { %1044 = vmatmul.mubr.msk.f32.vlgmr.msra.gmra.mxu0 %vm180_vm5, %v179_v54  ;;  %746 = vmatpush1.msra.mxu1 %v699_v10  ;;  %v619_v54 = vld [vmem:[#allocation5 + $0x68] sm:$0xff]  ;;  %v677_v7 = vld [vmem:[#allocation5 + $0x230] sm:$0xff] }
  0xcb   :  { %1059 = vmatprep.mubr.msk.f32.mxu0 %vm1153_vm0, %v1152_v32  ;;  %1058 = vmatpush3.msk.msra.mxu0 %vm379_vm6, %v123_v55  ;;  %v637_v32 = vld [vmem:[#allocation5 + $0xf8] sm:$0xff]  ;;  %v676_v10 = vld [vmem:[#allocation5 + $0x228] sm:$0xff] }
  0xcc   :  { %822 = vmatprep.subr.mxu0 %v637_v32  ;;  %747 = vmatprep.subr.mxu1 %v698_v16  ;;  %v682_v55 = vld [vmem:[#allocation5 + $0x258] sm:$0xff]  ;;  %v675_v16 = vld [vmem:[#allocation5 + $0x220] sm:$0xff] }
  0xcd   :  { %748 = vmatpush1.msra.mxu1 %v697_v18  ;;  %v613_v32 = vld [vmem:[#allocation5 + $0x38] sm:$0xff] }
  0xce   :  { %749 = vmatprep.subr.mxu1 %v696_v21  ;;  %v674_v18 = vld [vmem:[#allocation5 + $0x218] sm:$0xff] }
  0xcf   :  { %750 = vmatpush1.msra.mxu1 %v695_v27 }
  0xd0   :  { %751 = vmatprep.subr.mxu1 %v694_v29 }
  0xd1   :  { %752 = vmatpush1.msra.mxu1 %v693_v31  ;;  %v609_v31 = vld [vmem:[#allocation5 + $0x18] sm:$0xff] }
  0xd2   :  { %753 = vmatprep.subr.mxu1 %v692_v34  ;;  %v608_v34 = vld [vmem:[#allocation5 + $0x10] sm:$0xff] }
  0xd3   :  { %754 = vmatpush1.msra.mxu1 %v691_v36  ;;  %v607_v36 = vld [vmem:[#allocation5 + $0x8] sm:$0xff] }
  0xd4   :  { %755 = vmatprep.subr.mxu1 %v690_v38  ;;  %v606_v38 = vld [vmem:[#allocation5] sm:$0xff] }
  0xd5   :  { %756 = vmatpush1.msra.mxu1 %v689_v40  ;;  %v669_v40 = vld [vmem:[#allocation5 + $0x1f8] sm:$0xff] }
  0xd6   :  { %757 = vmatprep.subr.mxu1 %v688_v42  ;;  %v668_v42 = vld [vmem:[#allocation5 + $0x1f0] sm:$0xff] }
  0xd7   :  { %758 = vmatpush1.msra.mxu1 %v687_v44  ;;  %v667_v44 = vld [vmem:[#allocation5 + $0x1e8] sm:$0xff] }
  0xd8   :  { %759 = vmatprep.subr.mxu1 %v686_v46  ;;  %v666_v46 = vld [vmem:[#allocation5 + $0x1e0] sm:$0xff] }
  0xd9   :  { %760 = vmatpush1.msra.mxu1 %v685_v52  ;;  %v728_v52 = vld [vmem:[#allocation5 + $0x3c8] sm:$0xff] }
  0xda   :  { %761 = vmatprep.subr.mxu1 %v684_v47  ;;  %v727_v47 = vld [vmem:[#allocation5 + $0x3c0] sm:$0xff] }
  0xdb   :  { %762 = vmatpush1.msra.mxu1 %v683_v50 }
  0xdc   :  { %763 = vmatprep.subr.mxu1 %v682_v55  ;;  %v663_v55 = vld [vmem:[#allocation5 + $0x1c8] sm:$0xff] }
 0x184   :  { %v369_v56 = vpop.f32.mrf.mxu1 }
 0x185   :  { %v373_v59 = vmax.f32 %v369_v56, 0.0  ;;  %v618_v56 = vld [vmem:[#allocation5 + $0x60] sm:$0xff] }
 0x186   :  { %v1056_v57 = vpop.f32.mrf.mxu1 }
 0x187   :  { %v681_v57 = vld [vmem:[#allocation5 + $0x250] sm:$0xff] }
 0x188   :  { %764 = vmatpush1.msra.mxu1 %v681_v57  ;;  %v1314_v57 = vsub.s32 1, %v1282_v48 }
 0x18a   :  { %v249_v58 = vpop.f32.mrf.mxu0 }
 0x18b   :  { %v253_v60 = vmax.f32 %v249_v58, 0.0  ;;  %v617_v58 = vld [vmem:[#allocation5 + $0x58] sm:$0xff] }
 0x18c   :  { %v1045_v61 = vpop.f32.mrf.mxu0 }
 0x18d   :  { %v374_v62 = vadd.f32 %v373_v59, %v253_v60  ;;  %v680_v59 = vld [vmem:[#allocation5 + $0x248] sm:$0xff]  ;;  %v616_v60 = vld [vmem:[#allocation5 + $0x50] sm:$0xff]  ;;  %v679_v61 = vld [vmem:[#allocation5 + $0x240] sm:$0xff] }
 0x18e   :  { %765 = vmatprep.subr.mxu1 %v680_v59  ;;  %v662_v59 = vld [vmem:[#allocation5 + $0x1c0] sm:$0xff] }
 0x18f   :  { %1060 = vmatmul.mubr.msk.f32.vlgmr.msra.gmra.mxu0 %vm375_vm7, %v374_v62  ;;  %v615_v62 = vld [vmem:[#allocation5 + $0x48] sm:$0xff]  ;;  %766 = vmatpush1.msra.mxu1 %v679_v61  ;;  %v661_v61 = vld [vmem:[#allocation5 + $0x1b8] sm:$0xff] }
 0x190   :  { %823 = vmatpush1.msra.mxu0 %v636_v11  ;;  %v612_v11 = vld [vmem:[#allocation5 + $0x30] sm:$0xff]  ;;  %767 = vmatprep.subr.mxu1 %v678_v63 }
 0x191   :  { %824 = vmatprep.subr.mxu0 %v635_v17  ;;  %v611_v17 = vld [vmem:[#allocation5 + $0x28] sm:$0xff]  ;;  %768 = vmatpush1.msra.mxu1 %v677_v7  ;;  %v660_v63 = vld [vmem:[#allocation5 + $0x1b0] sm:$0xff] }
 0x192   :  { %825 = vmatpush1.msra.mxu0 %v634_v19  ;;  %v610_v19 = vld [vmem:[#allocation5 + $0x20] sm:$0xff]  ;;  %769 = vmatprep.subr.mxu1 %v676_v10  ;;  %v659_v7 = vld [vmem:[#allocation5 + $0x1a8] sm:$0xff]  ;;  %v721_v10 = vld [vmem:[#allocation5 + $0x390] sm:$0xff] }
 0x193   :  { %826 = vmatprep.subr.mxu0 %v633_v20  ;;  %v673_v20 = vld [vmem:[#allocation5 + $0x210] sm:$0xff]  ;;  %770 = vmatpush1.msra.mxu1 %v675_v16  ;;  %v720_v16 = vld [vmem:[#allocation5 + $0x388] sm:$0xff] }
 0x194   :  { %827 = vmatpush1.msra.mxu0 %v632_v26  ;;  %771 = vmatprep.subr.mxu1 %v674_v18  ;;  %v719_v18 = vld [vmem:[#allocation5 + $0x380] sm:$0xff] }
 0x195   :  { %828 = vmatprep.subr.mxu0 %v631_v28  ;;  %772 = vmatpush1.msra.mxu1 %v673_v20  ;;  %v718_v20 = vld [vmem:[#allocation5 + $0x378] sm:$0xff] }
 0x196   :  { %829 = vmatpush1.msra.mxu0 %v630_v30  ;;  %v672_v30 = vld [vmem:[#allocation5 + $0x208] sm:$0xff] }
 0x197   :  { %830 = vmatprep.subr.mxu0 %v629_v33  ;;  %773 = vmatprep.subr.mxu1 %v672_v30  ;;  %v671_v33 = vld [vmem:[#allocation5 + $0x200] sm:$0xff] }
 0x198   :  { %831 = vmatpush1.msra.mxu0 %v628_v35  ;;  %774 = vmatpush1.msra.mxu1 %v671_v33  ;;  %v734_v35 = vld [vmem:[#allocation5 + $0x3f8] sm:$0xff]  ;;  %v715_v30 = vld [vmem:[#allocation5 + $0x360] sm:$0xff] }
 0x199   :  { %832 = vmatprep.subr.mxu0 %v627_v37  ;;  %775 = vmatprep.subr.mxu1 %v734_v35  ;;  %v733_v37 = vld [vmem:[#allocation5 + $0x3f0] sm:$0xff]  ;;  %v714_v33 = vld [vmem:[#allocation5 + $0x358] sm:$0xff] }
 0x19a   :  { %833 = vmatpush1.msra.mxu0 %v626_v39  ;;  %776 = vmatpush2.msra.mxu1 %v733_v37  ;;  %v732_v39 = vld [vmem:[#allocation5 + $0x3e8] sm:$0xff]  ;;  %v713_v35 = vld [vmem:[#allocation5 + $0x350] sm:$0xff] }
 0x19b   :  { %834 = vmatprep.subr.mxu0 %v625_v41  ;;  %777 = vmatprep.subr.mxu1 %v732_v39  ;;  %v731_v41 = vld [vmem:[#allocation5 + $0x3e0] sm:$0xff]  ;;  %v712_v37 = vld [vmem:[#allocation5 + $0x348] sm:$0xff] }
 0x19c   :  { %835 = vmatpush1.msra.mxu0 %v624_v43  ;;  %778 = vmatpush2.msra.mxu1 %v731_v41  ;;  %v730_v43 = vld [vmem:[#allocation5 + $0x3d8] sm:$0xff]  ;;  %v711_v39 = vld [vmem:[#allocation5 + $0x340] sm:$0xff] }
 0x19d   :  { %836 = vmatprep.subr.mxu0 %v623_v45  ;;  %779 = vmatprep.subr.mxu1 %v730_v43  ;;  %v729_v45 = vld [vmem:[#allocation5 + $0x3d0] sm:$0xff]  ;;  %v710_v41 = vld [vmem:[#allocation5 + $0x338] sm:$0xff] }
 0x19e   :  { %837 = vmatpush1.msra.mxu0 %v622_v51  ;;  %v1310_v51 = vsub.s32 0, %v1282_v48  ;;  %780 = vmatpush2.msra.mxu1 %v729_v45  ;;  %v709_v43 = vld [vmem:[#allocation5 + $0x330] sm:$0xff]  ;;  %v708_v45 = vld [vmem:[#allocation5 + $0x328] sm:$0xff] }
 0x19f   :  { %838 = vmatprep.subr.mxu0 %v621_v53  ;;  %v665_v53 = vld [vmem:[#allocation5 + $0x1d8] sm:$0xff]  ;;  %781 = vmatprep.subr.mxu1 %v728_v52  ;;  %v707_v52 = vld [vmem:[#allocation5 + $0x320] sm:$0xff] }
 0x1a0   :  { %839 = vmatpush1.msra.mxu0 %v620_v49  ;;  %v664_v49 = vld [vmem:[#allocation5 + $0x1d0] sm:$0xff]  ;;  %782 = vmatpush2.msra.mxu1 %v727_v47  ;;  %v706_v47 = vld [vmem:[#allocation5 + $0x318] sm:$0xff] }
 0x1a1   :  { %840 = vmatprep.subr.mxu0 %v619_v54  ;;  %v726_v54 = vld [vmem:[#allocation5 + $0x3b8] sm:$0xff] }
 0x1a2   :  { %841 = vmatpush1.msra.mxu0 %v618_v56  ;;  %783 = vmatprep.subr.mxu1 %v726_v54  ;;  %v642_v54 = vld [vmem:[#allocation5 + $0x120] sm:$0xff] }
 0x1a3   :  { %842 = vmatprep.subr.mxu0 %v617_v58  ;;  %v725_v58 = vld [vmem:[#allocation5 + $0x3b0] sm:$0xff] }
 0x1a4   :  { %843 = vmatpush1.msra.mxu0 %v616_v60  ;;  %784 = vmatpush2.msra.mxu1 %v725_v58  ;;  %v724_v60 = vld [vmem:[#allocation5 + $0x3a8] sm:$0xff]  ;;  %v703_v58 = vld [vmem:[#allocation5 + $0x300] sm:$0xff] }
 0x1a5   :  { %844 = vmatprep.subr.mxu0 %v615_v62  ;;  %v723_v62 = vld [vmem:[#allocation5 + $0x3a0] sm:$0xff]  ;;  %785 = vmatprep.subr.mxu1 %v724_v60  ;;  %v639_v60 = vld [vmem:[#allocation5 + $0x108] sm:$0xff] }
 0x1a6   :  { %845 = vmatpush1.msra.mxu0 %v614_v3  ;;  %v722_v3 = vld [vmem:[#allocation5 + $0x398] sm:$0xff]  ;;  %786 = vmatpush2.msra.mxu1 %v723_v62 }
 0x1a7   :  { %846 = vmatprep.subr.mxu0 %v613_v32  ;;  %787 = vmatprep.subr.mxu1 %v722_v3 }
 0x1a8   :  { %847 = vmatpush1.msra.mxu0 %v612_v11  ;;  %v658_v11 = vld [vmem:[#allocation5 + $0x1a0] sm:$0xff]  ;;  %788 = vmatpush2.msra.mxu1 %v721_v10 }
 0x1a9   :  { %848 = vmatprep.subr.mxu0 %v611_v17  ;;  %v657_v17 = vld [vmem:[#allocation5 + $0x198] sm:$0xff]  ;;  %789 = vmatprep.subr.mxu1 %v720_v16 }
 0x1aa   :  { %849 = vmatpush1.msra.mxu0 %v610_v19  ;;  %v656_v19 = vld [vmem:[#allocation5 + $0x190] sm:$0xff]  ;;  %790 = vmatpush2.msra.mxu1 %v719_v18 }
 0x1ab   :  { %850 = vmatprep.subr.mxu0 %v609_v31  ;;  %791 = vmatprep.subr.mxu1 %v718_v20  ;;  %v652_v31 = vld [vmem:[#allocation5 + $0x170] sm:$0xff] }
 0x1ac   :  { %851 = vmatpush1.msra.mxu0 %v608_v34  ;;  %v651_v34 = vld [vmem:[#allocation5 + $0x168] sm:$0xff] }
 0x1ad   :  { %852 = vmatprep.subr.mxu0 %v607_v36  ;;  %v650_v36 = vld [vmem:[#allocation5 + $0x160] sm:$0xff] }
 0x1ae   :  { %853 = vmatpush1.msra.mxu0 %v606_v38  ;;  %v649_v38 = vld [vmem:[#allocation5 + $0x158] sm:$0xff] }
 0x1af   :  { %854 = vmatprep.subr.mxu0 %v669_v40  ;;  %v648_v40 = vld [vmem:[#allocation5 + $0x150] sm:$0xff] }
 0x1b0   :  { %855 = vmatpush2.msra.mxu0 %v668_v42  ;;  %v647_v42 = vld [vmem:[#allocation5 + $0x148] sm:$0xff] }
 0x1b1   :  { %856 = vmatprep.subr.mxu0 %v667_v44  ;;  %v646_v44 = vld [vmem:[#allocation5 + $0x140] sm:$0xff] }
 0x1b2   :  { %857 = vmatpush2.msra.mxu0 %v666_v46  ;;  %v645_v46 = vld [vmem:[#allocation5 + $0x138] sm:$0xff] }
 0x1b3   :  { %858 = vmatprep.subr.mxu0 %v665_v53  ;;  %v644_v53 = vld [vmem:[#allocation5 + $0x130] sm:$0xff] }
 0x1b4   :  { %859 = vmatpush2.msra.mxu0 %v664_v49  ;;  %v643_v49 = vld [vmem:[#allocation5 + $0x128] sm:$0xff] }
 0x1b5   :  { %860 = vmatprep.subr.mxu0 %v663_v55  ;;  %v704_v55 = vld [vmem:[#allocation5 + $0x308] sm:$0xff] }
 0x1b6   :  { %861 = vmatpush2.msra.mxu0 %v662_v59  ;;  %v640_v59 = vld [vmem:[#allocation5 + $0x110] sm:$0xff] }
 0x1b7   :  { %862 = vmatprep.subr.mxu0 %v661_v61  ;;  %v638_v61 = vld [vmem:[#allocation5 + $0x100] sm:$0xff] }
 0x1b8   :  { %863 = vmatpush2.msra.mxu0 %v660_v63 }
 0x1b9   :  { %864 = vmatprep.subr.mxu0 %v659_v7 }
 0x1ba   :  { %865 = vmatpush2.msra.mxu0 %v658_v11 }
 0x1bb   :  { %866 = vmatprep.subr.mxu0 %v657_v17 }
 0x1bc   :  { %867 = vmatpush2.msra.mxu0 %v656_v19 }
 0x24f   :  { %v449_v21 = vpop.f32.mrf.mxu0 }
 0x250   :  { %v1020_v26 = vmul.f32 -1.442695, %v449_v21  ;;  %v655_v21 = vld [vmem:[#allocation5 + $0x188] sm:$0xff] }
 0x251   :  { %v1061_v27 = vpop.f32.mrf.mxu0  ;;  %868 = vmatprep.subr.mxu0 %v655_v21 }
 0x252   :  { %1070 = vpow2.f32 %v1020_v26  ;;  %v717_v26 = vld [vmem:[#allocation5 + $0x370] sm:$0xff]  ;;  %v654_v27 = vld [vmem:[#allocation5 + $0x180] sm:$0xff] }
 0x253   :  { %792 = vmatpush2.msra.mxu1 %v717_v26  ;;  %869 = vmatpush2.msra.mxu0 %v654_v27 }
 0x25f   :  { %v1071_v28 = vpop.eup %1070 }
 0x260   :  { %v456_v29 = vadd.f32 1.0, %v1071_v28  ;;  %v716_v28 = vld [vmem:[#allocation5 + $0x368] sm:$0xff] }
 0x261   :  { %793 = vmatprep.subr.mxu1 %v716_v28 }
 0x262   :  { %1072 = vrcp.f32 %v456_v29  ;;  %v653_v29 = vld [vmem:[#allocation5 + $0x178] sm:$0xff]  ;;  %794 = vmatpush2.msra.mxu1 %v715_v30 }
 0x263   :  { %870 = vmatprep.subr.mxu0 %v653_v29  ;;  %795 = vmatprep.subr.mxu1 %v714_v33 }
 0x264   :  { %871 = vmatpush2.msra.mxu0 %v652_v31  ;;  %796 = vmatpush2.msra.mxu1 %v713_v35 }
 0x265   :  { %872 = vmatprep.subr.mxu0 %v651_v34  ;;  %797 = vmatprep.subr.mxu1 %v712_v37 }
 0x266   :  { %873 = vmatpush2.msra.mxu0 %v650_v36  ;;  %798 = vmatpush2.msra.mxu1 %v711_v39 }
 0x267   :  { %874 = vmatprep.subr.mxu0 %v649_v38  ;;  %799 = vmatprep.subr.mxu1 %v710_v41 }
 0x268   :  { %875 = vmatpush2.msra.mxu0 %v648_v40  ;;  %800 = vmatpush2.msra.mxu1 %v709_v43 }
 0x269   :  { %876 = vmatprep.subr.mxu0 %v647_v42  ;;  %801 = vmatprep.subr.mxu1 %v708_v45 }
 0x26a   :  { %877 = vmatpush2.msra.mxu0 %v646_v44  ;;  %802 = vmatpush2.msra.mxu1 %v707_v52 }
 0x26b   :  { %878 = vmatprep.subr.mxu0 %v645_v46  ;;  %803 = vmatprep.subr.mxu1 %v706_v47 }
 0x26c   :  { %879 = vmatpush2.msra.mxu0 %v644_v53 }
 0x26d   :  { %880 = vmatprep.subr.mxu0 %v643_v49 }
 0x26e   :  { %881 = vmatpush2.msra.mxu0 %v642_v54 }
 0x26f   :  { %v1073_v50 = vpop.eup %1072 }
 0x270   :  { %v462_v56 = vrot.slane %v1073_v50, %v1310_v51  ;;  %v481_v32 = vrot.slane %v1073_v50, %v1314_v57  ;;  %v705_v50 = vld [vmem:[#allocation5 + $0x310] sm:$0xff] }
 0x271   :  { %804 = vmatpush2.msra.mxu1 %v705_v50 }
 0x272   :  { %468 = vbcast.lane.b32.xlu1 %v462_v56, 264  ;;  %464 = vbcast.lane.b32.xlu0 %v462_v56, 256 }
 0x273   :  { %805 = vmatprep.subr.mxu1 %v704_v55 }
 0x274   :  { %806 = vmatpush2.msra.mxu1 %v703_v58 }
 0x276   :  { %483 = vbcast.lane.b32.xlu1 %v481_v32, 256  ;;  %472 = vbcast.lane.b32.xlu0 %v462_v56, 272 }
 0x27a   :  { %487 = vbcast.lane.b32.xlu1 %v481_v32, 264  ;;  %476 = vbcast.lane.b32.xlu0 %v462_v56, 280  ;;  %v641_v56 = vld [vmem:[#allocation5 + $0x118] sm:$0xff] }
 0x27b   :  { %882 = vmatprep.subr.mxu0 %v641_v56 }
 0x27c   :  { %883 = vmatpush2.msra.mxu0 %v640_v59 }
 0x27d   :  { %884 = vmatprep.subr.mxu0 %v639_v60 }
 0x27e   :  { %491 = vbcast.lane.b32.xlu1 %v481_v32, 272  ;;  %885 = vmatpush2.msra.mxu0 %v638_v61 }
 0x282   :  { %495 = vbcast.lane.b32.xlu1 %v481_v32, 280 }
 0x2e4   :  { %v469_v62 = vpop.permute.xlu1 %468  ;;  %v465_v63 = vpop.permute.xlu0 %464 }
 0x2e5   :  { %v1318_v3 = vmul.f32 %v469_v62, %v1209_v8  ;;  %v1321_v7 = vmul.f32 %v469_v62, %v1211_v9  ;;  %v1324_v32 = vmul.f32 %v465_v63, %v1197_v2  ;;  %v1327_v10 = vmul.f32 %v465_v63, %v1201_v4 }
 0x2e7   :  { %v513_v8 = vadd.f32 %v1318_v3, %v1324_v32  ;;  %v522_v9 = vadd.f32 %v1321_v7, %v1327_v10  ;;  %v554_v2 = vmax.f32 %v1324_v32, %v1318_v3  ;;  %v563_v4 = vmax.f32 %v1327_v10, %v1321_v7 }
 0x2e8   :  { %v484_v11 = vpop.permute.xlu1 %483  ;;  %v473_v16 = vpop.permute.xlu0 %472 }
 0x2e9   :  { %v1330_v17 = vmul.f32 %v473_v16, %v1221_v14  ;;  %v1333_v18 = vmul.f32 %v473_v16, %v1223_v15 }
 0x2eb   :  { %v514_v27 = vadd.f32 %v513_v8, %v1330_v17  ;;  %v523_v28 = vadd.f32 %v522_v9, %v1333_v18  ;;  %v555_v29 = vmax.f32 %v554_v2, %v1330_v17  ;;  %v564_v30 = vmax.f32 %v563_v4, %v1333_v18 }
 0x2ec   :  { %v488_v19 = vpop.permute.xlu1 %487  ;;  %v477_v20 = vpop.permute.xlu0 %476 }
 0x2ed   :  { %v1344_v14 = vmul.f32 %v488_v19, %v1203_v5  ;;  %v1347_v15 = vmul.f32 %v488_v19, %v1205_v6  ;;  %v1350_v21 = vmul.f32 %v477_v20, %v1241_v24  ;;  %v1353_v26 = vmul.f32 %v477_v20, %v1243_v25 }
 0x2ee   :  { %v1360_v5 = vmul.f32 %v484_v11, %v1193_v0  ;;  %v1363_v6 = vmul.f32 %v484_v11, %v1195_v1 }
 0x2ef   :  { %v515_v24 = vadd.f32 %v514_v27, %v1350_v21  ;;  %v524_v31 = vadd.f32 %v523_v28, %v1353_v26  ;;  %v556_v25 = vmax.f32 %v555_v29, %v1350_v21  ;;  %v565_v33 = vmax.f32 %v564_v30, %v1353_v26 }
 0x2f0   :  { %v492_v34 = vpop.permute.xlu1 %491  ;;  %v531_v35 = vadd.f32 %v1344_v14, %v1360_v5  ;;  %v540_v36 = vadd.f32 %v1347_v15, %v1363_v6  ;;  %v572_v41 = vmax.f32 %v1360_v5, %v1344_v14  ;;  %v581_v42 = vmax.f32 %v1363_v6, %v1347_v15 }
 0x2f1   :  { %v1374_v0 = vmul.f32 %v492_v34, %v1217_v12  ;;  %v1377_v1 = vmul.f32 %v492_v34, %v1219_v13  ;;  %v516_v37 = vrot.slane %v515_v24, 4  ;;  %v525_v38 = vrot.slane %v524_v31, 4 }
 0x2f2   :  { %v557_v39 = vrot.slane %v556_v25, 4  ;;  %v566_v40 = vrot.slane %v565_v33, 4 }
 0x2f3   :  { %v532_v43 = vadd.f32 %v531_v35, %v1374_v0  ;;  %v541_v44 = vadd.f32 %v540_v36, %v1377_v1  ;;  %v517_v45 = vadd.f32 %v516_v37, %v515_v24  ;;  %v526_v12 = vadd.f32 %v525_v38, %v524_v31 }
 0x2f4   :  { %v558_v46 = vmax.f32 %v556_v25, %v557_v39  ;;  %v567_v52 = vmax.f32 %v565_v33, %v566_v40  ;;  %v496_v13 = vpop.permute.xlu1 %495  ;;  %v573_v53 = vmax.f32 %v572_v41, %v1374_v0  ;;  %v582_v47 = vmax.f32 %v581_v42, %v1377_v1 }
 0x2f5   :  { %v1388_v49 = vmul.f32 %v496_v13, %v1237_v22  ;;  %v1391_v50 = vmul.f32 %v496_v13, %v1239_v23  ;;  %v518_v54 = vrot.slane %v517_v45, 2  ;;  %v527_v55 = vrot.slane %v526_v12, 2 }
 0x2f6   :  { %v559_v56 = vrot.slane %v558_v46, 2  ;;  %v568_v58 = vrot.slane %v567_v52, 2 }
 0x2f7   :  { %v533_v59 = vadd.f32 %v532_v43, %v1388_v49  ;;  %v542_v60 = vadd.f32 %v541_v44, %v1391_v50  ;;  %v574_v61 = vmax.f32 %v573_v53, %v1388_v49  ;;  %v583_v62 = vmax.f32 %v582_v47, %v1391_v50 }
 0x2f8   :  { %v519_v63 = vadd.f32 %v518_v54, %v517_v45  ;;  %v528_v11 = vadd.f32 %v527_v55, %v526_v12  ;;  %v560_v23 = vmax.f32 %v558_v46, %v559_v56  ;;  %v569_v2 = vmax.f32 %v567_v52, %v568_v58 }
 0x2f9   :  { %v534_v16 = vrot.slane %v533_v59, 4  ;;  %v543_v22 = vrot.slane %v542_v60, 4  ;;  %v575_v8 = vrot.slane %v574_v61, 4  ;;  %v584_v9 = vrot.slane %v583_v62, 4 }
 0x2fa   :  { %v529_v28 = vrot.slane %v528_v11, 1  ;;  %v520_v29 = vrot.slane %v519_v63, 1  ;;  %v570_v33 = vrot.slane %v569_v2, 1  ;;  %v561_v34 = vrot.slane %v560_v23, 1 }
 0x2fb   :  { %v535_v4 = vadd.f32 %v534_v16, %v533_v59  ;;  %v544_v19 = vadd.f32 %v543_v22, %v542_v60  ;;  %v576_v20 = vmax.f32 %v574_v61, %v575_v8  ;;  %v585_v27 = vmax.f32 %v583_v62, %v584_v9 }
 0x2fc   :  { %v530_v39 = vadd.f32 %v529_v28, %v528_v11  ;;  %v521_v40 = vadd.f32 %v520_v29, %v519_v63  ;;  %v571_v45 = vmax.f32 %v569_v2, %v570_v33  ;;  %v562_v12 = vmax.f32 %v560_v23, %v561_v34 }
 0x2fd   :  { %v536_v30 = vrot.slane %v535_v4, 2  ;;  %v545_v24 = vrot.slane %v544_v19, 2  ;;  %v577_v31 = vrot.slane %v576_v20, 2  ;;  %v586_v25 = vrot.slane %v585_v27, 2 }
 0x2fe   :  { %v551_v47 = vmul.f32 0.03125, %v530_v39  ;;  %v550_v54 = vmul.f32 0.03125, %v521_v40 }
 0x2ff   :  { %v537_v35 = vadd.f32 %v536_v30, %v535_v4  ;;  %v578_v36 = vmax.f32 %v576_v20, %v577_v31  ;;  %v587_v37 = vmax.f32 %v585_v27, %v586_v25  ;;  %v546_v38 = vadd.f32 %v545_v24, %v544_v19 }
 0x300   :  { %v1154_v27 = vmov 1966171168  }
 0x301   :  { %v588_v41 = vrot.slane %v587_v37, 1  ;;  %v579_v42 = vrot.slane %v578_v36, 1  ;;  %v547_v43 = vrot.slane %v546_v38, 1  ;;  %v538_v44 = vrot.slane %v537_v35, 1 }
 0x302   :  { %v925_v28 = vunpack.c.l.s4 %v1154_v27 }
 0x303   :  { %v589_v46 = vmax.f32 %v587_v37, %v588_v41  ;;  %v580_v52 = vmax.f32 %v578_v36, %v579_v42  ;;  %v548_v13 = vadd.f32 %v547_v43, %v546_v38  ;;  %v539_v53 = vadd.f32 %v538_v44, %v537_v35 }
 0x304   :  { %v926_v29 = vunpack.c.0.s8 %v925_v28 }
 0x305   :  { %v740_v55 = vsel %vm178_vm4, %v589_v46, %v571_v45  ;;  %v739_v56 = vsel %vm178_vm4, %v580_v52, %v562_v12  ;;  %v553_v58 = vmul.f32 0.03125, %v548_v13  ;;  %v552_v59 = vmul.f32 0.03125, %v539_v53 }
 0x306   :  { %807 = vmatprep.mubr.f32.mxu1 %v740_v55  ;;  %v929_v24 = vsub.s32 %v926_v29, %v1282_v48 }
 0x307   :  { %808 = vmatmul.mubr.f32.vlgmr.msra.gmra.mxu1 %v739_v56  ;;  %v819_v60 = vsel %vm178_vm4, %v553_v58, %v551_v47  ;;  %v818_v61 = vsel %vm178_vm4, %v552_v59, %v550_v54 }
 0x308   :  { %886 = vmatprep.mubr.f32.mxu0 %v819_v60 }
 0x309   :  { %887 = vmatmul.mubr.f32.vlgmr.msra.gmra.mxu0 %v818_v61 }
 0x3c7   :  { %v809_v62 = vpop.f32.mrf.mxu1 }
 0x3c9   :  { %v888_v63 = vpop.f32.mrf.mxu0  ;;  %v811_v16 = vpop.f32.mrf.mxu1 }
 0x3ca   :  { %v889_v11 = vadd.f32 %v888_v63, %v809_v62 }
 0x3cb   :  { %v890_v22 = vpop.f32.mrf.mxu0 }
 0x3cc   :  { %v1021_v8 = vmul.f32 -1.442695, %v889_v11  ;;  %v891_v9 = vadd.f32 %v890_v22, %v811_v16 }
 0x3ce   :  { %1074 = vpow2.f32 %v1021_v8  ;;  %v1022_v23 = vmul.f32 -1.442695, %v891_v9 }
 0x3d0   :  { %1076 = vpow2.f32 %v1022_v23 }
 0x3db   :  { %v1075_v2 = vpop.eup %1074 }
 0x3dc   :  { %v899_v4 = vadd.f32 1.0, %v1075_v2 }
 0x3dd   :  { %v1077_v19 = vpop.eup %1076 }
 0x3de   :  { %v900_v20 = vadd.f32 1.0, %v1077_v19  ;;  %1078 = vrcp.f32 %v899_v4 }
 0x3e0   :  { %1080 = vrcp.f32 %v900_v20 }
 0x3eb   :  { %v1079_v30 = vpop.eup %1078 }
 0x3ed   :  { %v1081_v31 = vpop.eup %1080 }
 0x3ee   :  { %v923_v25 = vcombine.low %v1079_v30, %v1081_v31 }
 0x3f0   :  { %v930_v33 = vrot.slane %v923_v25, %v929_v24 }
 0x3f2   :  { %v931_v34 = vcombine.high %v930_v33, %v930_v33  ;;  %v938_v35 = vrot.slane %v930_v33, %v929_v24 }
 0x3f4   :  { %v945_v36 = vrot.slane %v931_v34, %v929_v24  ;;  %v949_v37 = vrot.slane %v938_v35, %v1310_v51  ;;  %v953_v38 = vrot.slane %v938_v35, %v1314_v57 }
 0x3f6   :  { %v957_v39 = vrot.slane %v945_v36, %v1310_v51  ;;  %v961_v40 = vrot.slane %v945_v36, %v1314_v57  ;;  %v966_v41 = vmul.f32 %v949_v37, %v1324_v32  ;;  %v967_v42 = vmul.f32 %v953_v38, %v1327_v10 }
 0x3f7   :  { %v968_v48 = vmul.f32 %v949_v37, %v1318_v3  ;;  %v969_v43 = vmul.f32 %v953_v38, %v1321_v7  ;;  %v970_v44 = vmul.f32 %v949_v37, %v1330_v17  ;;  %v971_v45 = vmul.f32 %v953_v38, %v1333_v18 }
 0x3f8   :  { %v972_v12 = vmul.f32 %v949_v37, %v1350_v21  ;;  %v973_v51 = vmul.f32 %v953_v38, %v1353_v26  ;;  %v974_v57 = vmul.f32 %v957_v39, %v1360_v5  ;;  %v975_v32 = vmul.f32 %v961_v40, %v1363_v6  ;;  %982 = vst [vmem:[#allocation7] sm:$0xff] %v966_v41 }
 0x3f9   :  { %983 = vst [vmem:[#allocation7 + $0x8] sm:$0xff] %v967_v42  ;;  %v976_v3 = vmul.f32 %v957_v39, %v1344_v14  ;;  %v977_v7 = vmul.f32 %v961_v40, %v1347_v15  ;;  %v978_v10 = vmul.f32 %v957_v39, %v1374_v0  ;;  %v979_v17 = vmul.f32 %v961_v40, %v1377_v1 }
 0x3fa   :  { %984 = vst [vmem:[#allocation7 + $0x10] sm:$0xff] %v968_v48  ;;  %985 = vst [vmem:[#allocation7 + $0x18] sm:$0xff] %v969_v43  ;;  %v980_v18 = vmul.f32 %v957_v39, %v1388_v49  ;;  %v981_v21 = vmul.f32 %v961_v40, %v1391_v50 }
 0x3fb   :  { %986 = vst [vmem:[#allocation7 + $0x20] sm:$0xff] %v970_v44  ;;  %987 = vst [vmem:[#allocation7 + $0x28] sm:$0xff] %v971_v45 }
 0x3fc   :  { %988 = vst [vmem:[#allocation7 + $0x30] sm:$0xff] %v972_v12  ;;  %989 = vst [vmem:[#allocation7 + $0x38] sm:$0xff] %v973_v51 }
 0x3fd   :  { %990 = vst [vmem:[#allocation7 + $0x40] sm:$0xff] %v974_v57  ;;  %991 = vst [vmem:[#allocation7 + $0x48] sm:$0xff] %v975_v32 }
 0x3fe   :  { %992 = vst [vmem:[#allocation7 + $0x50] sm:$0xff] %v976_v3  ;;  %993 = vst [vmem:[#allocation7 + $0x58] sm:$0xff] %v977_v7 }
 0x3ff   :  { %994 = vst [vmem:[#allocation7 + $0x60] sm:$0xff] %v978_v10  ;;  %995 = vst [vmem:[#allocation7 + $0x68] sm:$0xff] %v979_v17 }
 0x400   :  { %996 = vst [vmem:[#allocation7 + $0x70] sm:$0xff] %v980_v18  ;;  %997 = vst [vmem:[#allocation7 + $0x78] sm:$0xff] %v981_v21 }
 0x401   :  { %1133 = shalt.err (!%p1130_p0)
}
 0x402   :  { %1009 = dma.vmem_to_hbm [thread:$0]  %s1004_s8, 2048, %s1432_s4, [#allocation4], %s1149_s18, %s1149_s18, %s1150_s19  }
 0x403   :  { %1146 = dma.done.wait [#allocation4], 2048  }
 0x404   :  { %1147 = vsyncadd [#allocation4], 4294965248 }
 0x405   :  { %1013 = vsyncpa [#allocation3], 1 }
 0x406   :  { %1014 = vsyncpa [#allocation6], 1 }
 0x407   :  { %1015 = vsyncpa [#allocation4], 1 }

</bundles_post_ra>
